<compile_context>
chip_gen: v7x
topology: tpu7x:2x2x1
jax: 0.10.0
libtpu: 0.0.40
codegen_flags: <defaults>
</compile_context>

<pallas_src>
import jax
import jax.numpy as jnp
from jax.experimental import pallas as pl
from jax.experimental.pallas import tpu as pltpu

# ----- model hyper-parameters (small, deterministic) -----
D_MODEL = 32
N_HEAD = 4
D_K = D_MODEL // N_HEAD          # 8
D_V = D_MODEL // N_HEAD          # 8
SEQ = 8
BATCH = 2
LN_EPS = 1e-5


def mha_kernel(x_ref, w_ref, bias_ref, ln_ref, out_ref, attn_ref):
    """Single invocation; every ref is the full array resident in VMEM.

    x_ref   : (3*B, S, D)  rows [0:B]=input_Q, [B:2B]=input_K, [2B:3B]=input_V
    w_ref   : (4, D, D)    W_Q, W_K, W_V, W_O (all stored as (in, out))
    bias_ref: (B, S, S)    additive mask bias (0 where kept, -1e9 where masked)
    ln_ref  : (2, 1, D)    gamma, beta
    """
    threeB, S, D = x_ref.shape
    B = threeB // 3
    H = N_HEAD
    dk = D // H
    dv = D // H
    N = B * H

    Xm = x_ref[...]                              # (3B, S, D)
    W = w_ref[...]                               # (4, D, D)
    bias = bias_ref[...]                         # (B, S, S)
    gamma = ln_ref[0]                            # (1, D)
    beta = ln_ref[1]                             # (1, D)

    x_q = Xm[0:B]                                # residual, (B, S, D)

    # ---- Q/K/V projections: one batched (3B,S,D)@(3B,D,D) contraction.
    # Weights replicated only over B (x2); leading-dim broadcast + merge only.
    Wm = jnp.broadcast_to(W[0:3][:, None], (3, B, D, D)).reshape(3 * B, D, D)
    qkv = jnp.einsum("nsd,nde->nse", Xm, Wm,
                     preferred_element_type=jnp.float32)          # (3B, S, D)

    scale = jnp.float32(1.0) / jnp.sqrt(jnp.float32(dk))
    Q = qkv[0:B] * scale                         # fold 1/sqrt(dk) into Q once
    K = qkv[B:2 * B]
    V = qkv[2 * B:3 * B]                         # each (B, S, H*dk)

    # ---- head split: static lane slices restacked on a *leading* axis
    # (n = b*H + h).  Last-two-dim layout is never reshaped/transposed.
    def heads(x):                                # (B, S, H*dk) -> (N, S, dk)
        return jnp.stack([x[:, :, h * dk:(h + 1) * dk] for h in range(H)],
                         axis=1).reshape(N, S, dk)

    q_h = heads(Q)
    k_h = heads(K)
    v_h = heads(V)

    # ---- scores + additive mask bias (single add; no compare/select).
    bias_n = jnp.broadcast_to(bias[:, None], (B, H, S, S)).reshape(N, S, S)
    s = jnp.einsum("nqe,nke->nqk", q_h, k_h,
                   preferred_element_type=jnp.float32) + bias_n   # (N, S, S)
    # NOTE: -1e9 additive masking matches masked_fill here because no row is
    # fully masked; a fully-masked row would still softmax to a finite
    # (near-uniform) distribution, like the reference.

    # ---- softmax along keys (EUP reciprocal + one Newton refinement step).
    m = jnp.max(s, axis=-1, keepdims=True)
    e = jnp.exp(s - m)
    den = jnp.sum(e, axis=-1, keepdims=True)
    inv = pl.reciprocal(den, approx=True)
    inv = inv * (jnp.float32(2.0) - den * inv)   # Newton step -> ~fp32 accuracy
    attn = e * inv                               # (N, S, S)

    # Single store of attention probabilities (leading-dim reshape only).
    # TODO(synk): attn last dim is 8 (<128 lanes) so this store is masked; a
    # lane-dense slab rewrite is not worth it for a 2 KB output.
    attn_ref[...] = attn.reshape(B, H, S, S).astype(attn_ref.dtype)

    # ---- attention-weighted values, then output projection.
    # sum_h ctx_h @ W_O[h] == concat_h(ctx_h) @ W_O; the head sum is a cheap
    # leading-axis reduction, W_O is replicated only over B (x2).
    ctx = jnp.einsum("nqk,nke->nqe", attn, v_h,
                     preferred_element_type=jnp.float32)          # (N, S, dv)
    wo = W[3]                                                     # (H*dv, D)
    wo_h = jnp.stack([wo[h * dv:(h + 1) * dv] for h in range(H)], axis=0)  # (H,dv,D)
    wo_n = jnp.broadcast_to(wo_h[None], (B, H, dv, D)).reshape(N, dv, D)
    proj_n = jnp.einsum("nqe,ned->nqd", ctx, wo_n,
                        preferred_element_type=jnp.float32)       # (N, S, D)
    proj = jnp.sum(proj_n.reshape(B, H, S, D), axis=1)            # (B, S, D)

    # ---- residual + LayerNorm (biased variance, like nn.LayerNorm).
    y = proj + x_q
    mean = jnp.mean(y, axis=-1, keepdims=True)
    var = jnp.mean(jnp.square(y - mean), axis=-1, keepdims=True)
    norm = (y - mean) * jax.lax.rsqrt(var + LN_EPS)
    out_ref[...] = (norm * gamma + beta).astype(out_ref.dtype)


@jax.jit
def multi_head_attention(input_Q, input_K, input_V, mask, params):
    """input_Q/K/V: [B, S, D]; mask: [B, S, S] (float 0/1, 1 == mask out)."""
    B, S, D = input_Q.shape
    H, dk, dv = N_HEAD, D_K, D_V
    wq, wk, wv, wo, gamma, beta = params

    # Coalesce 10 operands into 4 slabs (kernel is DMA-issue latency bound).
    x_packed = jnp.concatenate([input_Q, input_K, input_V], axis=0)   # (3B,S,D)
    w_packed = jnp.stack([wq, wk, wv, wo], axis=0)                    # (4,D,D)
    bias = mask.astype(jnp.float32) * jnp.float32(-1e9)               # (B,S,S)
    ln_packed = jnp.stack([gamma, beta], axis=0)                      # (2,1,D)

    flops = (2 * 3 * B * S * D * D                     # projections
             + 2 * B * H * (2 * S * S * dk)            # scores + ctx
             + 2 * B * H * (S * dv * D))               # output projection
    bytes_accessed = 4 * (3 * B * S * D + 4 * D * D + B * S * S + 2 * D
                          + B * S * D + B * H * S * S)
    cost = pl.CostEstimate(flops=flops,
                           transcendentals=B * H * S * S,
                           bytes_accessed=bytes_accessed)

    def full(shape):
        return pl.BlockSpec(shape, lambda i: (0,) * len(shape))

    # NOTE(v7x): with 2 TensorCores, prefer grid=(B,) and
    # dimension_semantics=("parallel",); on 1-TC v5e/v6e the collapsed
    # grid=(1,) avoids all per-step pipeline overhead.
    out, attn = pl.pallas_call(
        mha_kernel,
        out_shape=(
            jax.ShapeDtypeStruct((B, S, D), jnp.float32),
            jax.ShapeDtypeStruct((B, H, S, S), jnp.float32),
        ),
        grid_spec=pltpu.PrefetchScalarGridSpec(
            num_scalar_prefetch=0,
            grid=(1,),                          # whole problem resident in VMEM
            in_specs=[
                full((3 * B, S, D)),            # packed Q/K/V activations
                full((4, D, D)),                # packed W_Q, W_K, W_V, W_O
                full((B, S, S)),                # additive mask bias
                full((2, 1, D)),                # gamma / beta
            ],
            out_specs=[
                full((B, S, D)),                # output
                full((B, H, S, S)),             # attn
            ],
        ),
        compiler_params=pltpu.CompilerParams(
            dimension_semantics=("arbitrary",),
            vmem_limit_bytes=32 * 1024 * 1024),
        cost_estimate=cost,
    )(x_packed, w_packed, bias, ln_packed)
    return out, attn


def make_params(key):
    """Deterministic parameter init. Linear weights stored as (in, out)."""
    k1, k2, k3, k4 = jax.random.split(key, 4)
    scale = 1.0 / jnp.sqrt(jnp.float32(D_MODEL))
    wq = jax.random.normal(k1, (D_MODEL, D_K * N_HEAD), jnp.float32) * scale
    wk = jax.random.normal(k2, (D_MODEL, D_K * N_HEAD), jnp.float32) * scale
    wv = jax.random.normal(k3, (D_MODEL, D_V * N_HEAD), jnp.float32) * scale
    wo = jax.random.normal(k4, (D_V * N_HEAD, D_MODEL), jnp.float32) * scale
    gamma = jnp.ones((1, D_MODEL), jnp.float32)    # nn.LayerNorm default
    beta = jnp.zeros((1, D_MODEL), jnp.float32)
    return wq, wk, wv, wo, gamma, beta


def reference(input_Q, input_K, input_V, mask, params):
    """Pure-JAX reference of the PyTorch forward for a sanity check."""
    wq, wk, wv, wo, gamma, beta = params
    B, S, D = input_Q.shape
    def split_heads(x, d):
        return x.reshape(B, S, N_HEAD, d).transpose(0, 2, 1, 3)
    Q = split_heads(input_Q @ wq, D_K)
    K = split_heads(input_K @ wk, D_K)
    V = split_heads(input_V @ wv, D_V)
    scores = jnp.einsum("bhqd,bhkd->bhqk", Q, K) / jnp.sqrt(jnp.float32(D_K))
    scores = jnp.where(mask[:, None, :, :] > 0.5, -1e9, scores)
    attn = jax.nn.softmax(scores, axis=-1)
    ctx = jnp.einsum("bhqk,bhkd->bhqd", attn, V)
    ctx = ctx.transpose(0, 2, 1, 3).reshape(B, S, N_HEAD * D_V)
    y = ctx @ wo + input_Q
    mean = jnp.mean(y, axis=-1, keepdims=True)
    var = jnp.mean(jnp.square(y - mean), axis=-1, keepdims=True)
    out = (y - mean) * jax.lax.rsqrt(var + LN_EPS) * gamma + beta
    return out, attn


if __name__ == "__main__":
    key = jax.random.PRNGKey(0)
    kp, kq, kk, kv = jax.random.split(key, 4)
    params = make_params(kp)

    input_Q = jax.random.normal(kq, (BATCH, SEQ, D_MODEL), jnp.float32)
    input_K = jax.random.normal(kk, (BATCH, SEQ, D_MODEL), jnp.float32)
    input_V = jax.random.normal(kv, (BATCH, SEQ, D_MODEL), jnp.float32)

    # Padding-style mask: last 2 key positions of batch element 1 are masked out.
    mask = jnp.zeros((BATCH, SEQ, SEQ), jnp.float32)
    mask = mask.at[1, :, SEQ - 2:].set(1.0)

    out, attn = multi_head_attention(input_Q, input_K, input_V, mask, params)
    jax.block_until_ready(out)
    jax.block_until_ready(attn)

    ref_out, ref_attn = reference(input_Q, input_K, input_V, mask, params)
    assert jnp.allclose(out, ref_out, atol=2e-4, rtol=2e-4)
    assert jnp.allclose(attn, ref_attn, atol=2e-4, rtol=2e-4)

    print("KERNEL_OK")
</pallas_src>

<mosaic_0001>
module attributes {stable_mosaic.version = 11 : i64} {
  func.func @mha_kernel(%arg0: i32, %arg1: memref<6x8x32xf32, #tpu.memory_space<vmem>>, %arg2: memref<4x32x32xf32, #tpu.memory_space<vmem>>, %arg3: memref<2x8x8xf32, #tpu.memory_space<vmem>>, %arg4: memref<2x1x32xf32, #tpu.memory_space<vmem>>, %arg5: memref<2x8x32xf32, #tpu.memory_space<vmem>>, %arg6: memref<2x4x8x8xf32, #tpu.memory_space<vmem>>) attributes {dimension_semantics = [#tpu.dimension_semantics<arbitrary>], iteration_bounds = array<i64: 1>, scalar_prefetch = 0 : i64, scratch_operands = 0 : i64, tpu.core_type = #tpu.core_type<tc>, window_params = [{pipeline_mode = #tpu.pipeline_mode<synchronous>, transform_indices = @transform_0, window_bounds = array<i64: 6, 8, 32>}, {pipeline_mode = #tpu.pipeline_mode<synchronous>, transform_indices = @transform_1, window_bounds = array<i64: 4, 32, 32>}, {pipeline_mode = #tpu.pipeline_mode<synchronous>, transform_indices = @transform_2, window_bounds = array<i64: 2, 8, 8>}, {pipeline_mode = #tpu.pipeline_mode<synchronous>, transform_indices = @transform_3, window_bounds = array<i64: 2, 1, 32>}, {pipeline_mode = #tpu.pipeline_mode<synchronous>, transform_indices = @transform_4, window_bounds = array<i64: 2, 8, 32>}, {pipeline_mode = #tpu.pipeline_mode<synchronous>, transform_indices = @transform_5, window_bounds = array<i64: 2, 4, 8, 8>}]} {
    %c0 = arith.constant 0 : index
    %c0_0 = arith.constant 0 : index
    %c0_1 = arith.constant 0 : index
    %0 = vector.load %arg1[%c0, %c0_0, %c0_1] : memref<6x8x32xf32, #tpu.memory_space<vmem>>, vector<6x8x32xf32>
    %c0_2 = arith.constant 0 : index
    %c0_3 = arith.constant 0 : index
    %c0_4 = arith.constant 0 : index
    %1 = vector.load %arg2[%c0_2, %c0_3, %c0_4] : memref<4x32x32xf32, #tpu.memory_space<vmem>>, vector<4x32x32xf32>
    %c0_5 = arith.constant 0 : index
    %c0_6 = arith.constant 0 : index
    %c0_7 = arith.constant 0 : index
    %2 = vector.load %arg3[%c0_5, %c0_6, %c0_7] : memref<2x8x8xf32, #tpu.memory_space<vmem>>, vector<2x8x8xf32>
    %c0_8 = arith.constant 0 : index
    %c0_9 = arith.constant 0 : index
    %c0_10 = arith.constant 0 : index
    %3 = vector.load %arg4[%c0_8, %c0_9, %c0_10] : memref<2x1x32xf32, #tpu.memory_space<vmem>>, vector<1x1x32xf32>
    %4 = vector.shape_cast %3 : vector<1x1x32xf32> to vector<1x32xf32>
    %c1 = arith.constant 1 : index
    %c0_11 = arith.constant 0 : index
    %c0_12 = arith.constant 0 : index
    %5 = vector.load %arg4[%c1, %c0_11, %c0_12] : memref<2x1x32xf32, #tpu.memory_space<vmem>>, vector<1x1x32xf32>
    %6 = vector.shape_cast %5 : vector<1x1x32xf32> to vector<1x32xf32>
    %7 = vector.extract_strided_slice %0 {offsets = [0, 0, 0], sizes = [2, 8, 32], strides = [1, 1, 1]} : vector<6x8x32xf32> to vector<2x8x32xf32>
    %8 = vector.extract_strided_slice %1 {offsets = [0, 0, 0], sizes = [3, 32, 32], strides = [1, 1, 1]} : vector<4x32x32xf32> to vector<3x32x32xf32>
    %9 = vector.shape_cast %8 : vector<3x32x32xf32> to vector<3x1x32x32xf32>
    %10 = vector.shape_cast %9 : vector<3x1x32x32xf32> to vector<3x1x32x32xf32>
    %11 = vector.broadcast %10 : vector<3x1x32x32xf32> to vector<3x2x32x32xf32>
    %12 = vector.shape_cast %11 : vector<3x2x32x32xf32> to vector<6x32x32xf32>
    "tpu.trace_start"() <{level = 10 : i32, message = "nsd,nde->nse"}> : () -> ()
    %cst = arith.constant dense<0.000000e+00> : vector<6x8x32xf32>
    %13 = tpu.matmul %0, %12, %cst {dimension_numbers = #tpu.dot_dimension_numbers<[2], [1], [1], [2], [0, 0, 0, 1, 1, 2], [0], [0]>} : vector<6x8x32xf32>, vector<6x32x32xf32>, vector<6x8x32xf32> -> vector<6x8x32xf32>
    %cst_13 = arith.constant 8.000000e+00 : f32
    "tpu.trace_stop"() : () -> ()
    %14 = math.sqrt %cst_13 : f32
    %cst_14 = arith.constant 1.000000e+00 : f32
    %15 = arith.divf %cst_14, %14 : f32
    %16 = vector.extract_strided_slice %13 {offsets = [0, 0, 0], sizes = [2, 8, 32], strides = [1, 1, 1]} : vector<6x8x32xf32> to vector<2x8x32xf32>
    %17 = vector.broadcast %15 : f32 to vector<2x8x32xf32>
    %18 = arith.mulf %16, %17 : vector<2x8x32xf32>
    %19 = vector.extract_strided_slice %13 {offsets = [2, 0, 0], sizes = [2, 8, 32], strides = [1, 1, 1]} : vector<6x8x32xf32> to vector<2x8x32xf32>
    %20 = vector.extract_strided_slice %13 {offsets = [4, 0, 0], sizes = [2, 8, 32], strides = [1, 1, 1]} : vector<6x8x32xf32> to vector<2x8x32xf32>
    %21 = vector.extract_strided_slice %18 {offsets = [0, 0, 0], sizes = [2, 8, 8], strides = [1, 1, 1]} : vector<2x8x32xf32> to vector<2x8x8xf32>
    %22 = vector.extract_strided_slice %18 {offsets = [0, 0, 8], sizes = [2, 8, 8], strides = [1, 1, 1]} : vector<2x8x32xf32> to vector<2x8x8xf32>
    %23 = vector.extract_strided_slice %18 {offsets = [0, 0, 16], sizes = [2, 8, 8], strides = [1, 1, 1]} : vector<2x8x32xf32> to vector<2x8x8xf32>
    %24 = vector.extract_strided_slice %18 {offsets = [0, 0, 24], sizes = [2, 8, 8], strides = [1, 1, 1]} : vector<2x8x32xf32> to vector<2x8x8xf32>
    %25 = vector.shape_cast %21 : vector<2x8x8xf32> to vector<2x1x8x8xf32>
    %26 = vector.shape_cast %22 : vector<2x8x8xf32> to vector<2x1x8x8xf32>
    %27 = vector.shape_cast %23 : vector<2x8x8xf32> to vector<2x1x8x8xf32>
    %28 = vector.shape_cast %24 : vector<2x8x8xf32> to vector<2x1x8x8xf32>
    %29 = tpu.concatenate %25, %26, %27, %28 in 1 : vector<2x1x8x8xf32>, vector<2x1x8x8xf32>, vector<2x1x8x8xf32>, vector<2x1x8x8xf32> -> vector<2x4x8x8xf32>
    %30 = vector.shape_cast %29 : vector<2x4x8x8xf32> to vector<8x8x8xf32>
    %31 = vector.extract_strided_slice %19 {offsets = [0, 0, 0], sizes = [2, 8, 8], strides = [1, 1, 1]} : vector<2x8x32xf32> to vector<2x8x8xf32>
    %32 = vector.extract_strided_slice %19 {offsets = [0, 0, 8], sizes = [2, 8, 8], strides = [1, 1, 1]} : vector<2x8x32xf32> to vector<2x8x8xf32>
    %33 = vector.extract_strided_slice %19 {offsets = [0, 0, 16], sizes = [2, 8, 8], strides = [1, 1, 1]} : vector<2x8x32xf32> to vector<2x8x8xf32>
    %34 = vector.extract_strided_slice %19 {offsets = [0, 0, 24], sizes = [2, 8, 8], strides = [1, 1, 1]} : vector<2x8x32xf32> to vector<2x8x8xf32>
    %35 = vector.shape_cast %31 : vector<2x8x8xf32> to vector<2x1x8x8xf32>
    %36 = vector.shape_cast %32 : vector<2x8x8xf32> to vector<2x1x8x8xf32>
    %37 = vector.shape_cast %33 : vector<2x8x8xf32> to vector<2x1x8x8xf32>
    %38 = vector.shape_cast %34 : vector<2x8x8xf32> to vector<2x1x8x8xf32>
    %39 = tpu.concatenate %35, %36, %37, %38 in 1 : vector<2x1x8x8xf32>, vector<2x1x8x8xf32>, vector<2x1x8x8xf32>, vector<2x1x8x8xf32> -> vector<2x4x8x8xf32>
    %40 = vector.shape_cast %39 : vector<2x4x8x8xf32> to vector<8x8x8xf32>
    %41 = vector.extract_strided_slice %20 {offsets = [0, 0, 0], sizes = [2, 8, 8], strides = [1, 1, 1]} : vector<2x8x32xf32> to vector<2x8x8xf32>
    %42 = vector.extract_strided_slice %20 {offsets = [0, 0, 8], sizes = [2, 8, 8], strides = [1, 1, 1]} : vector<2x8x32xf32> to vector<2x8x8xf32>
    %43 = vector.extract_strided_slice %20 {offsets = [0, 0, 16], sizes = [2, 8, 8], strides = [1, 1, 1]} : vector<2x8x32xf32> to vector<2x8x8xf32>
    %44 = vector.extract_strided_slice %20 {offsets = [0, 0, 24], sizes = [2, 8, 8], strides = [1, 1, 1]} : vector<2x8x32xf32> to vector<2x8x8xf32>
    %45 = vector.shape_cast %41 : vector<2x8x8xf32> to vector<2x1x8x8xf32>
    %46 = vector.shape_cast %42 : vector<2x8x8xf32> to vector<2x1x8x8xf32>
    %47 = vector.shape_cast %43 : vector<2x8x8xf32> to vector<2x1x8x8xf32>
    %48 = vector.shape_cast %44 : vector<2x8x8xf32> to vector<2x1x8x8xf32>
    %49 = tpu.concatenate %45, %46, %47, %48 in 1 : vector<2x1x8x8xf32>, vector<2x1x8x8xf32>, vector<2x1x8x8xf32>, vector<2x1x8x8xf32> -> vector<2x4x8x8xf32>
    %50 = vector.shape_cast %49 : vector<2x4x8x8xf32> to vector<8x8x8xf32>
    %51 = vector.shape_cast %2 : vector<2x8x8xf32> to vector<2x1x8x8xf32>
    %52 = vector.shape_cast %51 : vector<2x1x8x8xf32> to vector<2x1x8x8xf32>
    %53 = vector.broadcast %52 : vector<2x1x8x8xf32> to vector<2x4x8x8xf32>
    %54 = vector.shape_cast %53 : vector<2x4x8x8xf32> to vector<8x8x8xf32>
    "tpu.trace_start"() <{level = 10 : i32, message = "nqe,nke->nqk"}> : () -> ()
    %cst_15 = arith.constant dense<0.000000e+00> : vector<8x8x8xf32>
    %55 = tpu.matmul %30, %40, %cst_15 {dimension_numbers = #tpu.dot_dimension_numbers<[2], [2], [1], [1], [0, 0, 0, 1, 1, 1], [0], [0]>} : vector<8x8x8xf32>, vector<8x8x8xf32>, vector<8x8x8xf32> -> vector<8x8x8xf32>
    "tpu.trace_stop"() : () -> ()
    %56 = arith.addf %55, %54 : vector<8x8x8xf32>
    %cst_16 = arith.constant dense<0xFF800000> : vector<8x8xf32>
    %57 = vector.multi_reduction <maximumf>, %56, %cst_16 [2] : vector<8x8x8xf32> to vector<8x8xf32>
    %58 = vector.shape_cast %57 : vector<8x8xf32> to vector<8x8x1xf32>
    %59 = vector.broadcast %58 : vector<8x8x1xf32> to vector<8x8x8xf32>
    %60 = arith.subf %56, %59 : vector<8x8x8xf32>
    %61 = math.exp %60 : vector<8x8x8xf32>
    %cst_17 = arith.constant dense<0.000000e+00> : vector<8x8xf32>
    %62 = vector.multi_reduction <add>, %61, %cst_17 [2] : vector<8x8x8xf32> to vector<8x8xf32>
    %63 = vector.shape_cast %62 : vector<8x8xf32> to vector<8x8x1xf32>
    %64 = tpu.reciprocal %63 {approx = true} : vector<8x8x1xf32> -> vector<8x8x1xf32>
    %65 = arith.mulf %63, %64 : vector<8x8x1xf32>
    %cst_18 = arith.constant 2.000000e+00 : f32
    %66 = vector.broadcast %cst_18 : f32 to vector<8x8x1xf32>
    %67 = arith.subf %66, %65 : vector<8x8x1xf32>
    %68 = arith.mulf %64, %67 : vector<8x8x1xf32>
    %69 = vector.broadcast %68 : vector<8x8x1xf32> to vector<8x8x8xf32>
    %70 = arith.mulf %61, %69 : vector<8x8x8xf32>
    %71 = vector.shape_cast %70 : vector<8x8x8xf32> to vector<2x4x8x8xf32>
    %c0_19 = arith.constant 0 : index
    %c0_20 = arith.constant 0 : index
    %c0_21 = arith.constant 0 : index
    %c0_22 = arith.constant 0 : index
    %72 = vector.load %arg6[%c0_19, %c0_20, %c0_21, %c0_22] : memref<2x4x8x8xf32, #tpu.memory_space<vmem>>, vector<2x4x8x8xf32>
    tpu.vector_store %arg6[%c0_19, %c0_20, %c0_21, %c0_22], %71 {strides = array<i32>} : memref<2x4x8x8xf32, #tpu.memory_space<vmem>>, vector<2x4x8x8xf32>,
    "tpu.trace_start"() <{level = 10 : i32, message = "nqk,nke->nqe"}> : () -> ()
    %cst_23 = arith.constant dense<0.000000e+00> : vector<8x8x8xf32>
    %73 = tpu.matmul %70, %50, %cst_23 {dimension_numbers = #tpu.dot_dimension_numbers<[2], [1], [1], [2], [0, 0, 0, 1, 1, 2], [0], [0]>} : vector<8x8x8xf32>, vector<8x8x8xf32>, vector<8x8x8xf32> -> vector<8x8x8xf32>
    "tpu.trace_stop"() : () -> ()
    %74 = vector.extract_strided_slice %1 {offsets = [3, 0, 0], sizes = [1, 32, 32], strides = [1, 1, 1]} : vector<4x32x32xf32> to vector<1x32x32xf32>
    %75 = vector.shape_cast %74 : vector<1x32x32xf32> to vector<32x32xf32>
    %76 = vector.extract_strided_slice %75 {offsets = [0, 0], sizes = [8, 32], strides = [1, 1]} : vector<32x32xf32> to vector<8x32xf32>
    %77 = vector.extract_strided_slice %75 {offsets = [8, 0], sizes = [8, 32], strides = [1, 1]} : vector<32x32xf32> to vector<8x32xf32>
    %78 = vector.extract_strided_slice %75 {offsets = [16, 0], sizes = [8, 32], strides = [1, 1]} : vector<32x32xf32> to vector<8x32xf32>
    %79 = vector.extract_strided_slice %75 {offsets = [24, 0], sizes = [8, 32], strides = [1, 1]} : vector<32x32xf32> to vector<8x32xf32>
    %80 = vector.shape_cast %76 : vector<8x32xf32> to vector<1x8x32xf32>
    %81 = vector.shape_cast %77 : vector<8x32xf32> to vector<1x8x32xf32>
    %82 = vector.shape_cast %78 : vector<8x32xf32> to vector<1x8x32xf32>
    %83 = vector.shape_cast %79 : vector<8x32xf32> to vector<1x8x32xf32>
    %84 = tpu.concatenate %80, %81, %82, %83 in 0 : vector<1x8x32xf32>, vector<1x8x32xf32>, vector<1x8x32xf32>, vector<1x8x32xf32> -> vector<4x8x32xf32>
    %85 = vector.shape_cast %84 : vector<4x8x32xf32> to vector<1x4x8x32xf32>
    %86 = vector.shape_cast %85 : vector<1x4x8x32xf32> to vector<1x4x8x32xf32>
    %87 = vector.broadcast %86 : vector<1x4x8x32xf32> to vector<2x4x8x32xf32>
    %88 = vector.shape_cast %87 : vector<2x4x8x32xf32> to vector<8x8x32xf32>
    "tpu.trace_start"() <{level = 10 : i32, message = "nqe,ned->nqd"}> : () -> ()
    %cst_24 = arith.constant dense<0.000000e+00> : vector<8x8x32xf32>
    %89 = tpu.matmul %73, %88, %cst_24 {dimension_numbers = #tpu.dot_dimension_numbers<[2], [1], [1], [2], [0, 0, 0, 1, 1, 2], [0], [0]>} : vector<8x8x8xf32>, vector<8x8x32xf32>, vector<8x8x32xf32> -> vector<8x8x32xf32>
    "tpu.trace_stop"() : () -> ()
    %90 = vector.shape_cast %89 : vector<8x8x32xf32> to vector<2x4x8x32xf32>
    %cst_25 = arith.constant dense<0.000000e+00> : vector<2x8x32xf32>
    %91 = vector.multi_reduction <add>, %90, %cst_25 [1] : vector<2x4x8x32xf32> to vector<2x8x32xf32>
    %92 = arith.addf %91, %7 : vector<2x8x32xf32>
    %cst_26 = arith.constant dense<0.000000e+00> : vector<2x8xf32>
    %93 = vector.multi_reduction <add>, %92, %cst_26 [2] : vector<2x8x32xf32> to vector<2x8xf32>
    %94 = vector.shape_cast %93 : vector<2x8xf32> to vector<2x8x1xf32>
    %cst_27 = arith.constant 3.200000e+01 : f32
    %95 = vector.broadcast %cst_27 : f32 to vector<2x8x1xf32>
    %96 = arith.divf %94, %95 : vector<2x8x1xf32>
    %97 = vector.broadcast %96 : vector<2x8x1xf32> to vector<2x8x32xf32>
    %98 = arith.subf %92, %97 : vector<2x8x32xf32>
    %99 = arith.mulf %98, %98 : vector<2x8x32xf32>
    %cst_28 = arith.constant dense<0.000000e+00> : vector<2x8xf32>
    %100 = vector.multi_reduction <add>, %99, %cst_28 [2] : vector<2x8x32xf32> to vector<2x8xf32>
    %101 = vector.shape_cast %100 : vector<2x8xf32> to vector<2x8x1xf32>
    %cst_29 = arith.constant 3.200000e+01 : f32
    %102 = vector.broadcast %cst_29 : f32 to vector<2x8x1xf32>
    %103 = arith.divf %101, %102 : vector<2x8x1xf32>
    %104 = vector.broadcast %96 : vector<2x8x1xf32> to vector<2x8x32xf32>
    %105 = arith.subf %92, %104 : vector<2x8x32xf32>
    %cst_30 = arith.constant 9.99999974E-6 : f32
    %106 = vector.broadcast %cst_30 : f32 to vector<2x8x1xf32>
    %107 = arith.addf %103, %106 : vector<2x8x1xf32>
    %108 = math.rsqrt %107 : vector<2x8x1xf32>
    %109 = vector.broadcast %108 : vector<2x8x1xf32> to vector<2x8x32xf32>
    %110 = arith.mulf %105, %109 : vector<2x8x32xf32>
    %111 = vector.shape_cast %4 : vector<1x32xf32> to vector<1x1x32xf32>
    %112 = vector.broadcast %111 : vector<1x1x32xf32> to vector<2x8x32xf32>
    %113 = arith.mulf %110, %112 : vector<2x8x32xf32>
    %114 = vector.shape_cast %6 : vector<1x32xf32> to vector<1x1x32xf32>
    %115 = vector.broadcast %114 : vector<1x1x32xf32> to vector<2x8x32xf32>
    %116 = arith.addf %113, %115 : vector<2x8x32xf32>
    %c0_31 = arith.constant 0 : index
    %c0_32 = arith.constant 0 : index
    %c0_33 = arith.constant 0 : index
    %117 = vector.load %arg5[%c0_31, %c0_32, %c0_33] : memref<2x8x32xf32, #tpu.memory_space<vmem>>, vector<2x8x32xf32>
    tpu.vector_store %arg5[%c0_31, %c0_32, %c0_33], %116 {strides = array<i32>} : memref<2x8x32xf32, #tpu.memory_space<vmem>>, vector<2x8x32xf32>,
    return
  }
  func.func @transform_0(%arg0: i32) -> (i32, i32, i32) {
    %c0_i32 = arith.constant 0 : i32
    %c0_i32_0 = arith.constant 0 : i32
    %c0_i32_1 = arith.constant 0 : i32
    %c0_i32_2 = arith.constant 0 : i32
    return %c0_i32, %c0_i32_0, %c0_i32_1 : i32, i32, i32
  }
  func.func @transform_1(%arg0: i32) -> (i32, i32, i32) {
    %c0_i32 = arith.constant 0 : i32
    %c0_i32_0 = arith.constant 0 : i32
    %c0_i32_1 = arith.constant 0 : i32
    %c0_i32_2 = arith.constant 0 : i32
    return %c0_i32, %c0_i32_0, %c0_i32_1 : i32, i32, i32
  }
  func.func @transform_2(%arg0: i32) -> (i32, i32, i32) {
    %c0_i32 = arith.constant 0 : i32
    %c0_i32_0 = arith.constant 0 : i32
    %c0_i32_1 = arith.constant 0 : i32
    %c0_i32_2 = arith.constant 0 : i32
    return %c0_i32, %c0_i32_0, %c0_i32_1 : i32, i32, i32
  }
  func.func @transform_3(%arg0: i32) -> (i32, i32, i32) {
    %c0_i32 = arith.constant 0 : i32
    %c0_i32_0 = arith.constant 0 : i32
    %c0_i32_1 = arith.constant 0 : i32
    %c0_i32_2 = arith.constant 0 : i32
    return %c0_i32, %c0_i32_0, %c0_i32_1 : i32, i32, i32
  }
  func.func @transform_4(%arg0: i32) -> (i32, i32, i32) {
    %c0_i32 = arith.constant 0 : i32
    %c0_i32_0 = arith.constant 0 : i32
    %c0_i32_1 = arith.constant 0 : i32
    %c0_i32_2 = arith.constant 0 : i32
    return %c0_i32, %c0_i32_0, %c0_i32_1 : i32, i32, i32
  }
  func.func @transform_5(%arg0: i32) -> (i32, i32, i32, i32) {
    %c0_i32 = arith.constant 0 : i32
    %c0_i32_0 = arith.constant 0 : i32
    %c0_i32_1 = arith.constant 0 : i32
    %c0_i32_2 = arith.constant 0 : i32
    %c0_i32_3 = arith.constant 0 : i32
    return %c0_i32, %c0_i32_0, %c0_i32_1, %c0_i32_2 : i32, i32, i32, i32
  }
}

</mosaic_0001>

<bundles_post_ra>
// kernel: multi_head_attention.1
= control target key start
LH: loop header
LB: loop body
LE: loop exit
PB: predicated region body
PF: predicated region fallthrough
CT: control target
= control target key end

     0   :  { %11 = vsyncpa [#allocation3], 0  ;;  %v2946_v3 = vmov 0.0|0.0   ;;  %vm2947_vm0 = vmmov 0   ;;  %v2948_v6 = vmov 0.0   ;;  %s3327_s0 = inlined_call_operand.vmem [shape: f32[6,8,32], index: 0, kind: input, shape index: {}]   ;;  %s3328_s1 = inlined_call_operand.vmem [shape: f32[4,32,32], index: 1, kind: input, shape index: {}]   ;;  %s3329_s2 = inlined_call_operand.vmem [shape: f32[2,8,8], index: 2, kind: input, shape index: {}]   ;;  %s3330_s3 = inlined_call_operand.vmem [shape: f32[2,1,32], index: 3, kind: input, shape index: {}]   ;;  %s3331_s4 = inlined_call_operand.hbm [shape: f32[2,8,32], index: 4, kind: output, shape index: {0}]   ;;  %s3332_s5 = inlined_call_operand.hbm [shape: f32[2,4,8,8], index: 5, kind: output, shape index: {1}]  }
   0x1   :  { %v27_v0 = vld [vmem:[%s3328_s1] sm:$0xff]  ;;  %v28_v1 = vld [vmem:[%s3328_s1 + $0x8] sm:$0xff]  ;;  %v29_v2 = vld [vmem:[%s3328_s1 + $0x10] sm:$0xff]  ;;  %2816 = vmatprep.subr.bf16.mxu0 %v2946_v3  ;;  %2822 = vmatprep.subr.bf16.mxu1 %v2946_v3 }
   0x2   :  { %v2817_v4 = vpack.c.bf16 %v28_v1, %v27_v0  ;;  %v30_v5 = vld [vmem:[%s3328_s1 + $0x18] sm:$0xff]  ;;  %2638 = vmatprep.mubr.msk.f32.mxu0 %vm2947_vm0, %v2948_v6  ;;  %2649 = vmatprep.mubr.msk.f32.mxu1 %vm2947_vm0, %v2948_v6  ;;  %v31_v8 = vld [vmem:[%s3328_s1 + $0x20] sm:$0xff]  ;;  %v32_v9 = vld [vmem:[%s3328_s1 + $0x28] sm:$0xff] }
   0x3   :  { %v2820_v7 = vpack.c.bf16 %v30_v5, %v29_v2 }
   0x4   :  { %2818 = vmatpush3.bf16.msra.mxu0 %v2817_v4  ;;  %2824 = vmatpush3.bf16.msra.mxu1 %v2817_v4 }
   0x5   :  { %2819 = vmatprep.subr.bf16.mxu0 %v2946_v3  ;;  %2825 = vmatprep.subr.bf16.mxu1 %v2946_v3 }
   0x6   :  { %12 = vsyncpa [#allocation5], 0  ;;  %v3011_v10 = vld [vmem:[%s3327_s0] sm:$0xff]  ;;  %vm48_vm1 = vcmask 261120   ;;  %v2829_v11 = vpack.c.bf16 %v32_v9, %v31_v8  ;;  %v3016_v12 = vld [vmem:[%s3327_s0 + $0x8] sm:$0xff]  ;;  %s2949_s29 = smov 120  }
   0x7   :  { %v33_v13 = vld [vmem:[%s3328_s1 + $0x30] sm:$0xff]  ;;  %v34_v14 = vld [vmem:[%s3328_s1 + $0x38] sm:$0xff]  ;;  %v35_v16 = vld [vmem:[%s3328_s1 + $0x40] sm:$0xff]  ;;  %s2950_s30 = smov 112   ;;  %vm537_vm2 = vcmask 64512   ;;  %s2951_s6 = smov 104  }
   0x8   :  { %2821 = vmatpush3.bf16.msra.mxu0 %v2820_v7  ;;  %2827 = vmatpush3.bf16.msra.mxu1 %v2820_v7  ;;  %v2832_v15 = vpack.c.bf16 %v34_v14, %v33_v13  ;;  %v36_v17 = vld [vmem:[%s3328_s1 + $0x48] sm:$0xff]  ;;  %v23_v18 = vld [vmem:[%s3327_s0 + $0x10] sm:$0xff]  ;;  %v24_v20 = vld [vmem:[%s3327_s0 + $0x18] sm:$0xff] }
   0x9   :  { %2828 = vmatprep.subr.bf16.mxu0 %v2946_v3  ;;  %2834 = vmatprep.subr.bf16.mxu1 %v2946_v3  ;;  %v2841_v19 = vpack.c.bf16 %v36_v17, %v35_v16  ;;  %v37_v21 = vld [vmem:[%s3328_s1 + $0x50] sm:$0xff]  ;;  %v38_v22 = vld [vmem:[%s3328_s1 + $0x58] sm:$0xff]  ;;  %v25_v24 = vld [vmem:[%s3327_s0 + $0x20] sm:$0xff] }
   0xa   :  { %v2844_v23 = vpack.c.bf16 %v38_v22, %v37_v21  ;;  %v26_v25 = vld [vmem:[%s3327_s0 + $0x28] sm:$0xff]  ;;  %v43_v52 = vld [vmem:[%s3329_s2] sm:$0xff] }
   0xb   :  { %2639 = vmatmul.mubr.msk.f32.vlgmr.msra.gmra.mrb[0].mxu0 %vm48_vm1, %v3011_v10  ;;  %2650 = vmatmul.mubr.msk.f32.vlgmr.msra.gmra.mrb[0].mxu1 %vm48_vm1, %v3016_v12  ;;  %v44_v2 = vld [vmem:[%s3329_s2 + $0x8] sm:$0xff] }
   0xc   :  { %2830 = vmatpush3.bf16.msra.mxu0 %v2829_v11  ;;  %2660 = vmatprep.mubr.msk.f32.mxu0 %vm2947_vm0, %v2948_v6 }
   0xd   :  { %2831 = vmatprep.subr.bf16.mxu0 %v2946_v3  ;;  %2836 = vmatpush3.bf16.msra.mxu1 %v2829_v11 }
   0xe   :  { %2837 = vmatprep.subr.bf16.mxu1 %v2946_v3  ;;  %2671 = vmatprep.mubr.msk.f32.mxu1 %vm2947_vm0, %v2948_v6 }
  0x10   :  { %2833 = vmatpush3.bf16.msra.mxu0 %v2832_v15 }
  0x11   :  { %2839 = vmatpush3.bf16.msra.mxu1 %v2832_v15  ;;  %2840 = vmatprep.subr.bf16.mxu0 %v2946_v3 }
  0x12   :  { %2846 = vmatprep.subr.bf16.mxu1 %v2946_v3 }
  0x13   :  { %2661 = vmatmul.mubr.msk.f32.vlgmr.msra.gmra.mrb[2].mxu0 %vm48_vm1, %v23_v18 }
  0x14   :  { %2672 = vmatmul.mubr.msk.f32.vlgmr.msra.gmra.mrb[2].mxu1 %vm48_vm1, %v24_v20  ;;  %2842 = vmatpush3.bf16.msra.mxu0 %v2841_v19 }
  0x15   :  { %2843 = vmatprep.subr.bf16.mxu0 %v2946_v3  ;;  %2682 = vmatprep.mubr.msk.f32.mxu0 %vm2947_vm0, %v2948_v6 }
  0x16   :  { %2848 = vmatpush3.bf16.msra.mxu1 %v2841_v19  ;;  %2693 = vmatprep.mubr.msk.f32.mxu1 %vm2947_vm0, %v2948_v6 }
  0x17   :  { %2849 = vmatprep.subr.bf16.mxu1 %v2946_v3 }
  0x18   :  { %2845 = vmatpush3.bf16.msra.mxu0 %v2844_v23 }
  0x19   :  { %2696 = vmatprep.subr.mxu0 %v2948_v6 }
  0x1a   :  { %2851 = vmatpush3.bf16.msra.mxu1 %v2844_v23 }
  0x1b   :  { %2701 = vmatprep.subr.mxu1 %v2948_v6  ;;  %2683 = vmatmul.mubr.msk.f32.vlgmr.msra.gmra.mrb[4].mxu0 %vm48_vm1, %v25_v24 }
  0x1c   :  { %2698 = vmatprep.mubr.msk.f32.mxu0 %vm2947_vm0, %v2948_v6 }
  0x1d   :  { %2694 = vmatmul.mubr.msk.f32.vlgmr.msra.gmra.mrb[4].mxu1 %vm48_vm1, %v26_v25 }
  0x1e   :  { %2703 = vmatprep.mubr.msk.f32.mxu1 %vm2947_vm0, %v2948_v6 }
  0xde   :  { %v118_v26 = vpop.f32.mrb[0].mxu0  ;;  %v191_v27 = vpop.f32.mrb[0].mxu1 }
  0xdf   :  { %v487_v28 = vmul.f32 0.35355338, %v118_v26  ;;  %v2640_v29 = vpop.f32.mrb[1].mxu0  ;;  %v2651_v30 = vpop.f32.mrb[1].mxu1  ;;  %v488_v35 = vmul.f32 0.35355338, %v191_v27 }
  0xe1   :  { %491 = vrot.lane.b32.xlu1 %v487_v28, %s2949_s29  ;;  %495 = vrot.lane.b32.xlu0 %v487_v28, %s2950_s30 }
  0xe5   :  { %499 = vrot.lane.b32.xlu1 %v487_v28, %s2951_s6 }
  0xe6   :  { %v264_v31 = vpop.f32.mrb[2].mxu0 }
  0xe7   :  { %505 = vrot.lane.b32.xlu0 %v264_v31, %s2949_s29  ;;  %v2662_v32 = vpop.f32.mrb[3].mxu0  ;;  %2697 = vmatpush3.xpose.msk.msra.mxu0 %vm537_vm2, %v264_v31  ;;  %v337_v33 = vpop.f32.mrb[2].mxu1 }
  0xe8   :  { %v2673_v34 = vpop.f32.mrb[3].mxu1  ;;  %2706 = vmatprep.subr.mxu0 %v2948_v6 }
  0xe9   :  { %513 = vrot.lane.b32.xlu1 %v264_v31, %s2951_s6 }
  0xea   :  { %2699 = vmatmul.mubr.msk.f32.vlgmr.msra.gmra.mrb[6].mxu0 %vm537_vm2, %v487_v28 }
  0xeb   :  { %509 = vrot.lane.b32.xlu0 %v264_v31, %s2950_s30  ;;  %2708 = vmatprep.mubr.msk.f32.mxu0 %vm2947_vm0, %v2948_v6 }
  0xed   :  { %511 = vrot.lane.b32.xlu1 %v337_v33, %s2950_s30 }
  0xee   :  { %v3087_v36 = vpop.f32.mrb[4].mxu0 }
  0xef   :  { %507 = vrot.lane.b32.xlu0 %v337_v33, %s2949_s29  ;;  %v2684_v37 = vpop.f32.mrb[5].mxu0 }
  0xf0   :  { %v3126_v50 = vpop.f32.mrb[4].mxu1 }
  0xf1   :  { %515 = vrot.lane.b32.xlu1 %v337_v33, %s2951_s6  ;;  %v2695_v51 = vpop.f32.mrb[5].mxu1 }
  0xf3   :  { %493 = vrot.lane.b32.xlu0 %v488_v35, %s2949_s29 }
  0xf5   :  { %501 = vrot.lane.b32.xlu1 %v488_v35, %s2951_s6 }
  0xf7   :  { %497 = vrot.lane.b32.xlu0 %v488_v35, %s2950_s30 }
 0x153   :  { %v492_v38 = vpop.permute.xlu1 %491  ;;  %v496_v39 = vpop.permute.xlu0 %495 }
 0x157   :  { %v500_v40 = vpop.permute.xlu1 %499 }
 0x159   :  { %v506_v41 = vpop.permute.xlu0 %505 }
 0x15a   :  { %2702 = vmatpush3.xpose.msk.msra.mxu1 %vm537_vm2, %v506_v41 }
 0x15b   :  { %v514_v42 = vpop.permute.xlu1 %513  ;;  %2711 = vmatprep.subr.mxu1 %v2948_v6 }
 0x15d   :  { %2704 = vmatmul.mubr.msk.f32.vlgmr.msra.gmra.mrb[6].mxu1 %vm537_vm2, %v492_v38  ;;  %v510_v43 = vpop.permute.xlu0 %509 }
 0x15e   :  { %2707 = vmatpush3.xpose.msk.msra.mxu0 %vm537_vm2, %v510_v43  ;;  %2712 = vmatpush3.xpose.msk.msra.mxu1 %vm537_vm2, %v514_v42 }
 0x15f   :  { %v512_v44 = vpop.permute.xlu1 %511  ;;  %2713 = vmatprep.mubr.msk.f32.mxu1 %vm2947_vm0, %v2948_v6  ;;  %2721 = vmatprep.subr.mxu1 %v2948_v6 }
 0x160   :  { %2716 = vmatprep.subr.mxu0 %v2948_v6 }
 0x161   :  { %2714 = vmatmul.mubr.msk.f32.vlgmr.msra.gmra.mrb[8].mxu1 %vm537_vm2, %v500_v40  ;;  %v508_v45 = vpop.permute.xlu0 %507  ;;  %2709 = vmatmul.mubr.msk.f32.vlgmr.msra.gmra.mrb[8].mxu0 %vm537_vm2, %v496_v39 }
 0x162   :  { %2717 = vmatpush3.xpose.msk.msra.mxu0 %vm537_vm2, %v337_v33  ;;  %2722 = vmatpush3.xpose.msk.msra.mxu1 %vm537_vm2, %v508_v45 }
 0x163   :  { %v516_v46 = vpop.permute.xlu1 %515  ;;  %2718 = vmatprep.mubr.msk.f32.mxu0 %vm2947_vm0, %v2948_v6  ;;  %2723 = vmatprep.mubr.msk.f32.mxu1 %vm2947_vm0, %v2948_v6 }
 0x164   :  { %2731 = vmatprep.subr.mxu1 %v2948_v6  ;;  %2726 = vmatprep.subr.mxu0 %v2948_v6 }
 0x165   :  { %v494_v47 = vpop.permute.xlu0 %493  ;;  %2719 = vmatmul.mubr.msk.f32.vlgmr.msra.gmra.mrb[10].mxu0 %vm537_vm2, %v488_v35 }
 0x166   :  { %2724 = vmatmul.mubr.msk.f32.vlgmr.msra.gmra.mrb[10].mxu1 %vm537_vm2, %v494_v47  ;;  %2727 = vmatpush3.xpose.msk.msra.mxu0 %vm537_vm2, %v512_v44 }
 0x167   :  { %2732 = vmatpush3.xpose.msk.msra.mxu1 %vm537_vm2, %v516_v46  ;;  %2733 = vmatprep.mubr.msk.f32.mxu1 %vm2947_vm0, %v2948_v6  ;;  %v502_v48 = vpop.permute.xlu1 %501 }
 0x168   :  { %2728 = vmatprep.mubr.msk.f32.mxu0 %vm2947_vm0, %v2948_v6  ;;  %2736 = vmatprep.subr.mxu0 %v2948_v6 }
 0x169   :  { %v498_v49 = vpop.permute.xlu0 %497  ;;  %2741 = vmatprep.subr.mxu1 %v2948_v6 }
 0x16a   :  { %2729 = vmatmul.mubr.msk.f32.vlgmr.msra.gmra.mrb[12].mxu0 %vm537_vm2, %v498_v49  ;;  %2734 = vmatmul.mubr.msk.f32.vlgmr.msra.gmra.mrb[12].mxu1 %vm537_vm2, %v502_v48 }
 0x16b   :  { %2737 = vmatpush3.msra.mxu0 %v3087_v36  ;;  %2738 = vmatprep.mubr.msk.f32.mxu0 %vm2947_vm0, %v2948_v6 }
 0x16c   :  { %2746 = vmatprep.subr.mxu0 %v2948_v6  ;;  %2743 = vmatprep.mubr.msk.f32.mxu1 %vm2947_vm0, %v2948_v6 }
 0x1bd   :  { %v608_v53 = vpop.f32.mrb[6].mxu0 }
 0x1be   :  { %v609_v54 = vadd.f32 %v608_v53, %v43_v52  ;;  %v2700_v55 = vpop.f32.mrb[7].mxu0 }
 0x1c0   :  { %v1130_v56 = vsel %vm537_vm2, %v609_v54, -inf }
 0x1c1   :  { %1131 = vmax.xlane.f32.xlu0 %v1130_v56 }
 0x230   :  { %v682_v57 = vpop.f32.mrb[6].mxu1 }
 0x231   :  { %v683_v58 = vadd.f32 %v682_v57, %v43_v52  ;;  %v2705_v59 = vpop.f32.mrb[7].mxu1 }
 0x233   :  { %v1133_v60 = vsel %vm537_vm2, %v683_v58, -inf }
 0x234   :  { %1134 = vmax.xlane.f32.xlu1 %v1133_v60  ;;  %v756_v61 = vpop.f32.mrb[8].mxu0  ;;  %v830_v62 = vpop.f32.mrb[8].mxu1 }
 0x235   :  { %v757_v63 = vadd.f32 %v756_v61, %v43_v52  ;;  %v2710_v0 = vpop.f32.mrb[9].mxu0  ;;  %v2715_v1 = vpop.f32.mrb[9].mxu1  ;;  %v831_v3 = vadd.f32 %v830_v62, %v43_v52 }
 0x237   :  { %v1136_v4 = vsel %vm537_vm2, %v757_v63, -inf  ;;  %v1139_v14 = vsel %vm537_vm2, %v831_v3, -inf }
 0x238   :  { %1137 = vmax.xlane.f32.xlu0 %v1136_v4  ;;  %v904_v5 = vpop.f32.mrb[10].mxu0 }
 0x239   :  { %v905_v7 = vadd.f32 %v904_v5, %v44_v2  ;;  %v2720_v8 = vpop.f32.mrb[11].mxu0  ;;  %v978_v9 = vpop.f32.mrb[10].mxu1 }
 0x23a   :  { %v2725_v11 = vpop.f32.mrb[11].mxu1  ;;  %v979_v13 = vadd.f32 %v978_v9, %v44_v2 }
 0x23b   :  { %v1142_v15 = vsel %vm537_vm2, %v905_v7, -inf }
 0x23c   :  { %1140 = vmax.xlane.f32.xlu0 %v1139_v14  ;;  %1143 = vmax.xlane.f32.xlu1 %v1142_v15  ;;  %v1145_v22 = vsel %vm537_vm2, %v979_v13, -inf }
 0x23d   :  { %v1052_v16 = vpop.f32.mrb[12].mxu0  ;;  %v1126_v17 = vpop.f32.mrb[12].mxu1 }
 0x23e   :  { %v1053_v18 = vadd.f32 %v1052_v16, %v44_v2  ;;  %v2730_v19 = vpop.f32.mrb[13].mxu0  ;;  %v2735_v20 = vpop.f32.mrb[13].mxu1  ;;  %v1127_v21 = vadd.f32 %v1126_v17, %v44_v2 }
 0x240   :  { %1146 = vmax.xlane.f32.xlu0 %v1145_v22  ;;  %v1148_v23 = vsel %vm537_vm2, %v1053_v18, -inf  ;;  %v1151_v24 = vsel %vm537_vm2, %v1127_v21, -inf }
 0x241   :  { %1149 = vmax.xlane.f32.xlu1 %v1148_v23 }
 0x244   :  { %1152 = vmax.xlane.f32.xlu0 %v1151_v24 }
 0x24e   :  { %v1132_v25 = vpop.xlane.xlu0 %1131 }
 0x24f   :  { %v1154_v26 = vsub.f32 %v609_v54, %v1132_v25 }
 0x251   :  { %v1162_v27 = vmul.f32 1.442695, %v1154_v26 }
 0x252   :  { %519 = vrot.lane.b32.xlu1 %v3087_v36, %s2949_s29 }
 0x253   :  { %2862 = vpow2.f32 %v1162_v27 }
 0x256   :  { %531 = vrot.lane.b32.xlu1 %v3087_v36, %s2951_s6 }
 0x25a   :  { %525 = vrot.lane.b32.xlu0 %v3087_v36, %s2950_s30  ;;  %521 = vrot.lane.b32.xlu1 %v3126_v50, %s2949_s29 }
 0x25d   :  { %v3150_v28 = vpop.eup %2862 }
 0x25e   :  { %v1178_v29 = vsel %vm537_vm2, %v3150_v28, 0.0 }
 0x27e   :  { %1179 = vadd.xlane.f32.xlu1 %v1178_v29 }
 0x2c1   :  { %v1135_v30 = vpop.xlane.xlu1 %1134 }
 0x2c2   :  { %v1155_v31 = vsub.f32 %v683_v58, %v1135_v30 }
 0x2c4   :  { %v1164_v32 = vmul.f32 1.442695, %v1155_v31 }
 0x2c5   :  { %v1138_v33 = vpop.xlane.xlu0 %1137 }
 0x2c6   :  { %2864 = vpow2.f32 %v1164_v32  ;;  %v1156_v34 = vsub.f32 %v757_v63, %v1138_v33 }
 0x2c8   :  { %v1166_v35 = vmul.f32 1.442695, %v1156_v34 }
 0x2c9   :  { %v1141_v36 = vpop.xlane.xlu0 %1140  ;;  %v1144_v37 = vpop.xlane.xlu1 %1143 }
 0x2ca   :  { %2866 = vpow2.f32 %v1166_v35  ;;  %v1157_v38 = vsub.f32 %v831_v3, %v1141_v36  ;;  %v1158_v39 = vsub.f32 %v905_v7, %v1144_v37 }
 0x2cc   :  { %v1168_v40 = vmul.f32 1.442695, %v1157_v38  ;;  %v1170_v41 = vmul.f32 1.442695, %v1158_v39 }
 0x2cd   :  { %v1147_v42 = vpop.xlane.xlu0 %1146 }
 0x2ce   :  { %2868 = vpow2.f32 %v1168_v40  ;;  %v1159_v43 = vsub.f32 %v979_v13, %v1147_v42  ;;  %v1150_v44 = vpop.xlane.xlu1 %1149 }
 0x2cf   :  { %2870 = vpow2.f32 %v1170_v41  ;;  %v1160_v45 = vsub.f32 %v1053_v18, %v1150_v44 }
 0x2d0   :  { %v3154_v46 = vpop.eup %2864  ;;  %v1172_v47 = vmul.f32 1.442695, %v1159_v43 }
 0x2d1   :  { %v1174_v48 = vmul.f32 1.442695, %v1160_v45  ;;  %v1153_v49 = vpop.xlane.xlu0 %1152  ;;  %v1181_v51 = vsel %vm537_vm2, %v3154_v46, 0.0 }
 0x2d2   :  { %2872 = vpow2.f32 %v1172_v47  ;;  %v1161_v52 = vsub.f32 %v1127_v21, %v1153_v49  ;;  %1182 = vadd.xlane.f32.xlu0 %v1181_v51  ;;  %v520_v53 = vpop.permute.xlu1 %519 }
 0x2d3   :  { %2874 = vpow2.f32 %v1174_v48  ;;  %2742 = vmatpush3.msra.mxu1 %v520_v53 }
 0x2d4   :  { %v3158_v54 = vpop.eup %2866  ;;  %v1176_v55 = vmul.f32 1.442695, %v1161_v52  ;;  %2751 = vmatprep.subr.mxu1 %v2948_v6 }
 0x2d5   :  { %v1184_v56 = vsel %vm537_vm2, %v3158_v54, 0.0  ;;  %v526_v14 = vpop.permute.xlu0 %525 }
 0x2d6   :  { %2876 = vpow2.f32 %v1176_v55  ;;  %1185 = vadd.xlane.f32.xlu1 %v1184_v56  ;;  %v532_v3 = vpop.permute.xlu1 %531  ;;  %v39_v56 = vld [vmem:[%s3328_s1 + $0x60] sm:$0xff] }
 0x2d8   :  { %v3163_v57 = vpop.eup %2868 }
 0x2d9   :  { %v3165_v58 = vpop.eup %2870  ;;  %v1187_v59 = vsel %vm537_vm2, %v3163_v57, 0.0 }
 0x2da   :  { %1188 = vadd.xlane.f32.xlu0 %v1187_v59  ;;  %v1190_v60 = vsel %vm537_vm2, %v3165_v58, 0.0  ;;  %v3187_v4 = vpop.permute.xlu1 %521 }
 0x2db   :  { %1191 = vadd.xlane.f32.xlu1 %v1190_v60  ;;  %v40_v60 = vld [vmem:[%s3328_s1 + $0x68] sm:$0xff] }
 0x2dc   :  { %v3171_v61 = vpop.eup %2872 }
 0x2dd   :  { %v3173_v62 = vpop.eup %2874  ;;  %v1193_v63 = vsel %vm537_vm2, %v3171_v61, 0.0 }
 0x2de   :  { %1194 = vadd.xlane.f32.xlu0 %v1193_v63  ;;  %v1196_v0 = vsel %vm537_vm2, %v3173_v62, 0.0 }
 0x2df   :  { %1197 = vadd.xlane.f32.xlu1 %v1196_v0  ;;  %v42_v0 = vld [vmem:[%s3328_s1 + $0x78] sm:$0xff] }
 0x2e0   :  { %v3179_v1 = vpop.eup %2876 }
 0x2e1   :  { %v1199_v2 = vsel %vm537_vm2, %v3179_v1, 0.0 }
 0x2e2   :  { %1200 = vadd.xlane.f32.xlu0 %v1199_v2 }
 0x2f0   :  { %533 = vrot.lane.b32.xlu1 %v3126_v50, %s2951_s6 }
 0x2f8   :  { %527 = vrot.lane.b32.xlu0 %v3126_v50, %s2950_s30 }
 0x30b   :  { %v1180_v5 = vpop.xlane.xlu1 %1179 }
 0x30c   :  { %2878 = vrcp.f32 %v1180_v5 }
 0x316   :  { %v2879_v7 = vpop.eup %2878 }
 0x317   :  { %v1210_v8 = vmul.f32 %v2879_v7, %v1180_v5 }
 0x319   :  { %v1218_v9 = vsub.f32 2.0, %v1210_v8 }
 0x31b   :  { %v1226_v11 = vmul.f32 %v2879_v7, %v1218_v9 }
 0x31d   :  { %v1234_v13 = vmul.f32 %v3150_v28, %v1226_v11 }
 0x31f   :  { %1242 = vst.msk [vmem:[#allocation4] sm:$0xff] %vm537_vm2, %v1234_v13  ;;  %2739 = vmatmul.mubr.msk.f32.vlgmr.msra.gmra.mrb[14].mxu0 %vm537_vm2, %v1234_v13 }
 0x320   :  { %2747 = vmatpush3.msra.mxu0 %v526_v14  ;;  %2748 = vmatprep.mubr.msk.f32.mxu0 %vm2947_vm0, %v2948_v6 }
 0x321   :  { %2756 = vmatprep.subr.mxu0 %v2948_v6 }
 0x35f   :  { %v1183_v15 = vpop.xlane.xlu0 %1182 }
 0x360   :  { %2880 = vrcp.f32 %v1183_v15 }
 0x363   :  { %v1186_v16 = vpop.xlane.xlu1 %1185 }
 0x364   :  { %2882 = vrcp.f32 %v1186_v16 }
 0x367   :  { %v1189_v17 = vpop.xlane.xlu0 %1188 }
 0x368   :  { %2884 = vrcp.f32 %v1189_v17  ;;  %v1192_v18 = vpop.xlane.xlu1 %1191 }
 0x369   :  { %2886 = vrcp.f32 %v1192_v18 }
 0x36a   :  { %v2881_v19 = vpop.eup %2880 }
 0x36b   :  { %v1211_v20 = vmul.f32 %v2881_v19, %v1183_v15  ;;  %v1195_v21 = vpop.xlane.xlu0 %1194 }
 0x36c   :  { %2888 = vrcp.f32 %v1195_v21  ;;  %v1198_v22 = vpop.xlane.xlu1 %1197 }
 0x36d   :  { %v1219_v23 = vsub.f32 2.0, %v1211_v20  ;;  %2890 = vrcp.f32 %v1198_v22 }
 0x36e   :  { %v2883_v24 = vpop.eup %2882 }
 0x36f   :  { %v1227_v25 = vmul.f32 %v2881_v19, %v1219_v23  ;;  %v1212_v26 = vmul.f32 %v2883_v24, %v1186_v16  ;;  %v1201_v27 = vpop.xlane.xlu0 %1200 }
 0x370   :  { %2892 = vrcp.f32 %v1201_v27 }
 0x371   :  { %v1235_v28 = vmul.f32 %v3154_v46, %v1227_v25  ;;  %v1220_v29 = vsub.f32 2.0, %v1212_v26 }
 0x372   :  { %v2885_v30 = vpop.eup %2884 }
 0x373   :  { %v2887_v31 = vpop.eup %2886  ;;  %1243 = vst.msk [vmem:[#allocation4 + $0x8] sm:$0xff] %vm537_vm2, %v1235_v28  ;;  %v1228_v32 = vmul.f32 %v2883_v24, %v1220_v29  ;;  %v1213_v33 = vmul.f32 %v2885_v30, %v1189_v17  ;;  %2744 = vmatmul.mubr.msk.f32.vlgmr.msra.gmra.mrb[14].mxu1 %vm537_vm2, %v1235_v28  ;;  %v528_v52 = vpop.permute.xlu0 %527 }
 0x374   :  { %v1214_v34 = vmul.f32 %v2887_v31, %v1192_v18  ;;  %2752 = vmatpush3.msra.mxu1 %v532_v3  ;;  %2753 = vmatprep.mubr.msk.f32.mxu1 %vm2947_vm0, %v2948_v6 }
 0x375   :  { %v1236_v35 = vmul.f32 %v3158_v54, %v1228_v32  ;;  %v1221_v36 = vsub.f32 2.0, %v1213_v33  ;;  %2761 = vmatprep.subr.mxu1 %v2948_v6 }
 0x376   :  { %v2889_v37 = vpop.eup %2888  ;;  %v1222_v38 = vsub.f32 2.0, %v1214_v34 }
 0x377   :  { %v2891_v39 = vpop.eup %2890  ;;  %1244 = vst.msk [vmem:[#allocation4 + $0x10] sm:$0xff] %vm537_vm2, %v1236_v35  ;;  %v1229_v40 = vmul.f32 %v2885_v30, %v1221_v36  ;;  %v1215_v41 = vmul.f32 %v2889_v37, %v1195_v21  ;;  %2749 = vmatmul.mubr.msk.f32.vlgmr.msra.gmra.mrb[16].mxu0 %vm537_vm2, %v1236_v35 }
 0x378   :  { %v1230_v42 = vmul.f32 %v2887_v31, %v1222_v38  ;;  %v1216_v43 = vmul.f32 %v2891_v39, %v1198_v22  ;;  %2757 = vmatpush3.msra.mxu0 %v3126_v50  ;;  %2758 = vmatprep.mubr.msk.f32.mxu0 %vm2947_vm0, %v2948_v6 }
 0x379   :  { %v1237_v44 = vmul.f32 %v3163_v57, %v1229_v40  ;;  %v1223_v45 = vsub.f32 2.0, %v1215_v41  ;;  %2766 = vmatprep.subr.mxu0 %v2948_v6 }
 0x37a   :  { %v2893_v46 = vpop.eup %2892  ;;  %v1238_v47 = vmul.f32 %v3165_v58, %v1230_v42  ;;  %v1224_v48 = vsub.f32 2.0, %v1216_v43  ;;  %v534_v58 = vpop.permute.xlu1 %533 }
 0x37b   :  { %1245 = vst.msk [vmem:[#allocation4 + $0x18] sm:$0xff] %vm537_vm2, %v1237_v44  ;;  %v1231_v49 = vmul.f32 %v2889_v37, %v1223_v45  ;;  %v1217_v51 = vmul.f32 %v2893_v46, %v1201_v27  ;;  %2754 = vmatmul.mubr.msk.f32.vlgmr.msra.gmra.mrb[16].mxu1 %vm537_vm2, %v1237_v44 }
 0x37c   :  { %1246 = vst.msk [vmem:[#allocation4 + $0x20] sm:$0xff] %vm537_vm2, %v1238_v47  ;;  %v1232_v50 = vmul.f32 %v2891_v39, %v1224_v48  ;;  %2759 = vmatmul.mubr.msk.f32.vlgmr.msra.gmra.mrb[18].mxu0 %vm537_vm2, %v1238_v47  ;;  %2762 = vmatpush3.msra.mxu1 %v3187_v4 }
 0x37d   :  { %v1239_v53 = vmul.f32 %v3171_v61, %v1231_v49  ;;  %v1225_v54 = vsub.f32 2.0, %v1217_v51  ;;  %2767 = vmatpush3.msra.mxu0 %v528_v52  ;;  %2763 = vmatprep.mubr.msk.f32.mxu1 %vm2947_vm0, %v2948_v6  ;;  %v41_v61 = vld [vmem:[%s3328_s1 + $0x70] sm:$0xff]  ;;  %s2952_s1 = smov [#allocation4]  }
 0x37e   :  { %v1240_v55 = vmul.f32 %v3173_v62, %v1232_v50  ;;  %2771 = vmatprep.subr.mxu1 %v2948_v6  ;;  %2768 = vmatprep.mubr.msk.f32.mxu0 %vm2947_vm0, %v2948_v6  ;;  %s2496_s17 = sshll.u32 %s2952_s1, 4  ;;  %s2497_s17 = int_to_ptr.vmem [resolvable:$true] %s2496_s17 }
 0x37f   :  { %1247 = vst.msk [vmem:[#allocation4 + $0x28] sm:$0xff] %vm537_vm2, %v1239_v53  ;;  %v1233_v57 = vmul.f32 %v2893_v46, %v1225_v54  ;;  %2764 = vmatmul.mubr.msk.f32.vlgmr.msra.gmra.mrb[18].mxu1 %vm537_vm2, %v1239_v53  ;;  %2776 = vmatprep.subr.mxu0 %v2948_v6  ;;  %s2898_s18 = scalar_lea.vmem %s2497_s17, 1024  ;;  %p2903_p1 = scmp.lt.s32.totalorder %s2497_s17, %s2497_s17 }
 0x380   :  { %1248 = vst.msk [vmem:[#allocation4 + $0x30] sm:$0xff] %vm537_vm2, %v1240_v55  ;;  %2772 = vmatpush3.msra.mxu1 %v534_v58  ;;  %2769 = vmatmul.mubr.msk.f32.vlgmr.msra.gmra.mrb[20].mxu0 %vm537_vm2, %v1240_v55  ;;  %p2899_p0 = scmp.ne.s32.totalorder %s2497_s17, %s2898_s18  ;;  %p2904_p2 = scmp.lt.s32.totalorder %s2898_s18, %s2898_s18 }
 0x381   :  { %v1241_v59 = vmul.f32 %v3179_v1, %v1233_v57  ;;  %2773 = vmatprep.mubr.msk.f32.mxu1 %vm2947_vm0, %v2948_v6  ;;  %2777 = vmatpush3.msra.mxu0 %v39_v56 }
 0x382   :  { %2778 = vmatprep.mubr.msk.f32.mxu0 %vm2947_vm0, %v2948_v6  ;;  %2781 = vmatprep.subr.mxu1 %v2948_v6  ;;  %p2905_p3 = por %p2904_p2, %p2903_p1 }
 0x383   :  { %1249 = vst.msk [vmem:[#allocation4 + $0x38] sm:$0xff] %vm537_vm2, %v1241_v59  ;;  %2774 = vmatmul.mubr.msk.f32.vlgmr.msra.gmra.mrb[20].mxu1 %vm537_vm2, %v1241_v59  ;;  %2786 = vmatprep.subr.mxu0 %v2948_v6 }
 0x384   :  { %2783 = vmatprep.mubr.msk.f32.mxu1 %vm2947_vm0, %v2948_v6  ;;  %2782 = vmatpush3.msra.mxu1 %v40_v60  ;;  %p2906_p4 = pnand %p2905_p3, %p2899_p0 }
 0x385   :  { %2791 = vmatprep.subr.mxu1 %v2948_v6 }
 0x3f2   :  { %v1319_v62 = vpop.f32.mrb[14].mxu0 }
 0x3f3   :  { %v2740_v63 = vpop.f32.mrb[15].mxu0  ;;  %2779 = vmatmul.mubr.msk.f32.vlgmr.msra.gmra.mrb[22].mxu0 %vm537_vm2, %v1319_v62 }
 0x3f4   :  { %2787 = vmatpush3.msra.mxu0 %v41_v61  ;;  %2788 = vmatprep.mubr.msk.f32.mxu0 %vm2947_vm0, %v2948_v6 }
 0x3f5   :  { %2796 = vmatprep.subr.mxu0 %v2948_v6 }
 0x446   :  { %v1392_v1 = vpop.f32.mrb[14].mxu1 }
 0x447   :  { %v2745_v2 = vpop.f32.mrb[15].mxu1  ;;  %2784 = vmatmul.mubr.msk.f32.vlgmr.msra.gmra.mrb[22].mxu1 %vm537_vm2, %v1392_v1 }
 0x448   :  { %2792 = vmatpush3.msra.mxu1 %v42_v0  ;;  %2793 = vmatprep.mubr.msk.f32.mxu1 %vm2947_vm0, %v2948_v6 }
 0x449   :  { %2801 = vmatprep.subr.mxu1 %v2948_v6 }
 0x44a   :  { %v1465_v3 = vpop.f32.mrb[16].mxu0 }
 0x44b   :  { %v2750_v4 = vpop.f32.mrb[17].mxu0  ;;  %2789 = vmatmul.mubr.msk.f32.vlgmr.msra.gmra.mrb[24].mxu0 %vm537_vm2, %v1465_v3 }
 0x44c   :  { %2797 = vmatpush3.msra.mxu0 %v39_v56  ;;  %2798 = vmatprep.mubr.msk.f32.mxu0 %vm2947_vm0, %v2948_v6 }
 0x44d   :  { %2806 = vmatprep.subr.mxu0 %v2948_v6 }
 0x44e   :  { %v1538_v5 = vpop.f32.mrb[16].mxu1 }
 0x44f   :  { %v1611_v7 = vpop.f32.mrb[18].mxu0  ;;  %v2755_v8 = vpop.f32.mrb[17].mxu1  ;;  %2794 = vmatmul.mubr.msk.f32.vlgmr.msra.gmra.mrb[24].mxu1 %vm537_vm2, %v1538_v5 }
 0x450   :  { %v2760_v9 = vpop.f32.mrb[19].mxu0  ;;  %2799 = vmatmul.mubr.msk.f32.vlgmr.msra.gmra.mrb[26].mxu0 %vm537_vm2, %v1611_v7  ;;  %2802 = vmatpush3.msra.mxu1 %v40_v60 }
 0x451   :  { %2803 = vmatprep.mubr.msk.f32.mxu1 %vm2947_vm0, %v2948_v6  ;;  %2807 = vmatpush3.msra.mxu0 %v41_v61 }
 0x452   :  { %v1684_v11 = vpop.f32.mrb[18].mxu1  ;;  %2808 = vmatprep.mubr.msk.f32.mxu0 %vm2947_vm0, %v2948_v6  ;;  %2811 = vmatprep.subr.mxu1 %v2948_v6 }
 0x453   :  { %v2765_v13 = vpop.f32.mrb[19].mxu1  ;;  %v1757_v14 = vpop.f32.mrb[20].mxu0  ;;  %2804 = vmatmul.mubr.msk.f32.vlgmr.msra.gmra.mrb[26].mxu1 %vm537_vm2, %v1684_v11 }
 0x454   :  { %v2770_v15 = vpop.f32.mrb[21].mxu0  ;;  %2809 = vmatmul.mubr.msk.f32.vlgmr.msra.gmra.mrb[28].mxu0 %vm537_vm2, %v1757_v14  ;;  %2812 = vmatpush3.msra.mxu1 %v42_v0 }
 0x455   :  { %2813 = vmatprep.mubr.msk.f32.mxu1 %vm2947_vm0, %v2948_v6 }
 0x456   :  { %v1830_v16 = vpop.f32.mrb[20].mxu1 }
 0x457   :  { %v2775_v17 = vpop.f32.mrb[21].mxu1  ;;  %2814 = vmatmul.mubr.msk.f32.vlgmr.msra.gmra.mrb[28].mxu1 %vm537_vm2, %v1830_v16 }
 0x4c6   :  { %v1903_v18 = vpop.f32.mrb[22].mxu0 }
 0x4c7   :  { %v2780_v19 = vpop.f32.mrb[23].mxu0  ;;  %v2418_v21 = vsel %vm48_vm1, %v1903_v18, 0.0 }
 0x51a   :  { %v1976_v20 = vpop.f32.mrb[22].mxu1 }
 0x51b   :  { %v2419_v22 = vsel %vm48_vm1, %v1976_v20, 0.0  ;;  %v2785_v23 = vpop.f32.mrb[23].mxu1 }
 0x51c   :  { %v2420_v24 = vadd.f32 %v2419_v22, %v2418_v21 }
 0x51e   :  { %v2049_v25 = vpop.f32.mrb[24].mxu0 }
 0x51f   :  { %v2421_v26 = vsel %vm48_vm1, %v2049_v25, 0.0  ;;  %v2790_v27 = vpop.f32.mrb[25].mxu0 }
 0x520   :  { %v2422_v28 = vadd.f32 %v2421_v26, %v2420_v24 }
 0x522   :  { %v2122_v29 = vpop.f32.mrb[24].mxu1 }
 0x523   :  { %v2423_v6 = vsel %vm48_vm1, %v2122_v29, 0.0  ;;  %v2195_v30 = vpop.f32.mrb[26].mxu0  ;;  %v2795_v31 = vpop.f32.mrb[25].mxu1 }
 0x524   :  { %v2424_v32 = vadd.f32 %v2423_v6, %v2422_v28  ;;  %v2800_v33 = vpop.f32.mrb[27].mxu0  ;;  %v2425_v36 = vsel %vm48_vm1, %v2195_v30, 0.0 }
 0x526   :  { %v2268_v34 = vpop.f32.mrb[26].mxu1  ;;  %v2432_v35 = vadd.f32 %v2424_v32, %v3011_v10 }
 0x527   :  { %v2426_v37 = vsel %vm48_vm1, %v2268_v34, 0.0  ;;  %v2805_v38 = vpop.f32.mrb[27].mxu1  ;;  %v2341_v39 = vpop.f32.mrb[28].mxu0 }
 0x528   :  { %v2427_v40 = vadd.f32 %v2426_v37, %v2425_v36  ;;  %v2428_v41 = vsel %vm48_vm1, %v2341_v39, 0.0  ;;  %v2810_v42 = vpop.f32.mrb[29].mxu0  ;;  %v2434_v43 = vsel %vm48_vm1, %v2432_v35, 0.0 }
 0x529   :  { %2435 = vadd.xlane.f32.xlu0 %v2434_v43 }
 0x52a   :  { %v2429_v44 = vadd.f32 %v2428_v41, %v2427_v40  ;;  %v2414_v45 = vpop.f32.mrb[28].mxu1 }
 0x52b   :  { %v2430_v46 = vsel %vm48_vm1, %v2414_v45, 0.0  ;;  %v2815_v47 = vpop.f32.mrb[29].mxu1 }
 0x52c   :  { %v2431_v48 = vadd.f32 %v2430_v46, %v2429_v44 }
 0x52e   :  { %v2433_v10 = vadd.f32 %v2431_v48, %v3016_v12 }
 0x530   :  { %v2437_v49 = vsel %vm48_vm1, %v2433_v10, 0.0 }
 0x531   :  { %2438 = vadd.xlane.f32.xlu1 %v2437_v49 }
 0x5b6   :  { %v2436_v51 = vpop.xlane.xlu0 %2435 }
 0x5b7   :  { %v2441_v50 = vmul.f32 0.03125, %v2436_v51 }
 0x5b9   :  { %v2443_v52 = vsub.f32 %v2432_v35, %v2441_v50 }
 0x5bb   :  { %v2445_v53 = vmul.f32 %v2443_v52, %v2443_v52 }
 0x5bd   :  { %v2447_v54 = vsel %vm48_vm1, %v2445_v53, 0.0 }
 0x5be   :  { %2448 = vadd.xlane.f32.xlu0 %v2447_v54  ;;  %v2439_v55 = vpop.xlane.xlu1 %2438 }
 0x5bf   :  { %v2442_v56 = vmul.f32 0.03125, %v2439_v55 }
 0x5c1   :  { %v2444_v57 = vsub.f32 %v2433_v10, %v2442_v56 }
 0x5c3   :  { %v2446_v58 = vmul.f32 %v2444_v57, %v2444_v57 }
 0x5c5   :  { %v2450_v59 = vsel %vm48_vm1, %v2446_v58, 0.0 }
 0x5c6   :  { %2451 = vadd.xlane.f32.xlu0 %v2450_v59 }
 0x5c7   :  { %2909 = shalt.err (!%p2906_p4)
}
 0x5c8   :  { %s2910_s21 = scalar_lea.hbm %s3332_s5, 1024 }
 0x5c9   :  { %p2911_p5 = scmp.ne.s32.totalorder %s3332_s5, %s2910_s21  ;;  %p2914_p6 = scmp.lt.u32.totalorder %s2910_s21, %s3332_s5 }
 0x5cb   :  { %p2916_p7 = pnand %p2914_p6, %p2911_p5 }
 0x5cd   :  { %2919 = shalt.err (!%p2916_p7)
}
 0x5ce   :  { %s2953_s26 = smov 128   ;;  %s2954_s27 = smov 8   ;;  %v2550_v2 = vld [vmem:[%s3330_s3] ss:$0 sm:$0xff]  ;;  %v2551_v4 = vld [vmem:[%s3330_s3 + $0x1] ss:$0 sm:$0xff] }
 0x5cf   :  { %2502 = dma.vmem_to_hbm [thread:$0]  %s2497_s17, 1024, %s3332_s5, [#allocation5], %s2953_s26, %s2953_s26, %s2954_s27  }
 0x5d0   :  { %s2955_s5 = smov [#allocation2]  }
 0x5d1   :  { %s2484_s8 = sshll.u32 %s2955_s5, 4  ;;  %s2485_s8 = int_to_ptr.vmem [resolvable:$true] %s2484_s8 }
 0x5d2   :  { %s2920_s9 = scalar_lea.vmem %s2485_s8, 256  ;;  %p2925_p9 = scmp.lt.s32.totalorder %s2485_s8, %s2485_s8 }
 0x5d3   :  { %p2921_p8 = scmp.ne.s32.totalorder %s2485_s8, %s2920_s9  ;;  %p2926_p10 = scmp.lt.s32.totalorder %s2920_s9, %s2920_s9 }
 0x5d5   :  { %p2927_p11 = por %p2926_p10, %p2925_p9 }
 0x5d7   :  { %p2928_p12 = pnand %p2927_p11, %p2921_p8 }
 0x64b   :  { %v2449_v12 = vpop.xlane.xlu0 %2448 }
 0x64c   :  { %v2453_v60 = vmul.f32 0.03125, %v2449_v12 }
 0x64e   :  { %v2455_v61 = vadd.f32 1e-05, %v2453_v60 }
 0x650   :  { %2894 = vrsqrt.f32 %v2455_v61 }
 0x653   :  { %v2452_v62 = vpop.xlane.xlu0 %2451 }
 0x654   :  { %v2454_v63 = vmul.f32 0.03125, %v2452_v62 }
 0x656   :  { %v2456_v0 = vadd.f32 1e-05, %v2454_v63 }
 0x658   :  { %2896 = vrsqrt.f32 %v2456_v0 }
 0x65a   :  { %v2895_v1 = vpop.eup %2894 }
 0x65b   :  { %v2459_v3 = vmul.f32 %v2895_v1, %v2443_v52 }
 0x65d   :  { %v2467_v5 = vmul.f32 %v2550_v2, %v2459_v3 }
 0x65f   :  { %v2475_v7 = vadd.f32 %v2551_v4, %v2467_v5 }
 0x661   :  { %2477 = vst.msk [vmem:[#allocation2] sm:$0xff] %vm48_vm1, %v2475_v7 }
 0x662   :  { %v2897_v8 = vpop.eup %2896 }
 0x663   :  { %v2460_v9 = vmul.f32 %v2897_v8, %v2444_v57 }
 0x665   :  { %v2468_v11 = vmul.f32 %v2550_v2, %v2460_v9 }
 0x667   :  { %v2476_v13 = vadd.f32 %v2551_v4, %v2468_v11 }
 0x669   :  { %2478 = vst.msk [vmem:[#allocation2 + $0x8] sm:$0xff] %vm48_vm1, %v2476_v13 }
 0x66a   :  { %2931 = shalt.err (!%p2928_p12)
}
 0x66b   :  { %s2932_s10 = scalar_lea.hbm %s3331_s4, 256 }
 0x66c   :  { %p2933_p13 = scmp.ne.s32.totalorder %s3331_s4, %s2932_s10  ;;  %p2936_p0 = scmp.lt.u32.totalorder %s2932_s10, %s3331_s4 }
 0x66e   :  { %p2938_p1 = pnand %p2936_p0, %p2933_p13 }
 0x670   :  { %2941 = shalt.err (!%p2938_p1)
}
 0x671   :  { %2490 = dma.vmem_to_hbm [thread:$0]  %s2485_s8, 256, %s3331_s4, [#allocation3], %s2953_s26, %s2953_s26, %s2954_s27  }
 0x672   :  { %2942 = dma.done.wait [#allocation3], 256  }
 0x673   :  { %2943 = vsyncadd [#allocation3], 4294967040 }
 0x674   :  { %2944 = dma.done.wait [#allocation5], 1024  }
 0x675   :  { %2945 = vsyncadd [#allocation5], 4294966272 }
 0x676   :  { %2509 = vsyncpa [#allocation3], 1 }
 0x677   :  { %2510 = vsyncpa [#allocation5], 1 }

</bundles_post_ra>
